<compile_context>
chip_gen: v7x
topology: tpu7x:2x2x1
jax: 0.10.0
libtpu: 0.0.40
codegen_flags: <defaults>
</compile_context>

<pallas_src>
import functools

import jax
import jax.numpy as jnp
from jax import lax
from jax.experimental import pallas as pl
from jax.experimental.pallas import tpu as pltpu


def _gather_kernel(tn, n_slots, idx_ref, table_hbm, out_ref, row_buf, sem):
    # idx_ref:   (N_pad,) int32 in SMEM (scalar prefetch)  — flat token ids
    # table_hbm: (V, D) in HBM (memory_space=pl.ANY)       — embedding table
    # out_ref:   (tn, D) VMEM output block for this token tile
    # row_buf:   (tn, D) VMEM scratch the row-DMAs land in
    # sem:       (n_slots,) DMA semaphores (ring of in-flight copies)
    i = pl.program_id(0)
    base = i * tn

    def start(r):
        row = idx_ref[base + r]
        pltpu.make_async_copy(
            table_hbm.at[pl.ds(row, 1)],      # (1, D) row in HBM
            row_buf.at[pl.ds(r, 1)],          # (1, D) slot in VMEM
            sem.at[r % n_slots],
        ).start()

    def wait(r):
        # Descriptor only needs matching shapes + the right semaphore.
        pltpu.make_async_copy(
            table_hbm.at[pl.ds(0, 1)],
            row_buf.at[pl.ds(r, 1)],
            sem.at[r % n_slots],
        ).wait()

    # Prime the DMA ring.
    n_prime = min(n_slots, tn)

    def prime_body(r, carry):
        start(r)
        return carry

    lax.fori_loop(0, n_prime, prime_body, 0)

    # Steady state: wait for row r, immediately refill its slot with row r+n_slots.
    def steady_body(r, carry):
        wait(r)

        @pl.when(r + n_slots < tn)
        def _():
            start(r + n_slots)

        return carry

    lax.fori_loop(0, tn, steady_body, 0)

    # Lane-dense vector store of the gathered tile.
    out_ref[...] = row_buf[...]


def _round_up(x, m):
    return -(-x // m) * m


def word_embedding(word_indices, table, *, tn=256, n_slots=8):
    """Equivalent of Word_Embedding.forward: table[word_indices]."""
    B, S = word_indices.shape
    V, D = table.shape
    N = B * S

    # Clamp indices: TPU DMAs have no runtime bounds check (PyTorch would raise).
    idx = jnp.clip(word_indices.reshape(N).astype(jnp.int32), 0, V - 1)

    # Token-tile size: multiple of 8 (f32 sublane), no larger than needed.
    tn_eff = max(8, _round_up(min(tn, _round_up(N, 8)), 8))
    n_tiles = -(-N // tn_eff)
    n_pad = n_tiles * tn_eff
    if n_pad != N:
        idx = jnp.pad(idx, (0, n_pad - N))   # pad with row 0, sliced off below

    slots = min(n_slots, tn_eff)
    kernel = functools.partial(_gather_kernel, tn_eff, slots)

    out = pl.pallas_call(
        kernel,
        out_shape=jax.ShapeDtypeStruct((n_pad, D), table.dtype),
        grid_spec=pltpu.PrefetchScalarGridSpec(
            num_scalar_prefetch=1,                      # token ids -> SMEM
            grid=(n_tiles,),
            in_specs=[
                pl.BlockSpec(memory_space=pl.ANY),      # table stays in HBM
            ],
            out_specs=pl.BlockSpec((tn_eff, D), lambda i, idx_ref: (i, 0)),
            scratch_shapes=[
                pltpu.VMEM((tn_eff, D), table.dtype),   # gather landing buffer
                pltpu.SemaphoreType.DMA((slots,)),      # DMA ring semaphores
            ],
        ),
        compiler_params=pltpu.CompilerParams(
            dimension_semantics=("parallel",),          # megacore-shardable
        ),
    )(idx, table)

    return out[:N].reshape(B, S, D)


def init_embedding_table(key, vocab_size, embedding_dim):
    # nn.Embedding init: N(0, 1); padding_idx=0 row is zeroed (forward semantics).
    # TODO(synk): padding_idx gradient masking / from_pretrained(freeze=...) are
    # training-time semantics; only the forward pass is implemented here.
    w = jax.random.normal(key, (vocab_size, embedding_dim), dtype=jnp.float32)
    w = w.at[0].set(0.0)
    return w


if __name__ == "__main__":
    key = jax.random.PRNGKey(0)
    k_tab, k_idx = jax.random.split(key)

    vocab_size = 64
    embedding_dim = 256   # multiple of 128 -> lane-dense output stores
    B, S = 2, 8

    table = init_embedding_table(k_tab, vocab_size, embedding_dim)
    word_indices = jax.random.randint(k_idx, (B, S), 0, vocab_size, dtype=jnp.int32)

    out = jax.block_until_ready(word_embedding(word_indices, table))

    # Reference check (plain JAX gather == PyTorch nn.Embedding forward).
    ref = jnp.take(table, word_indices, axis=0)
    assert out.shape == (B, S, embedding_dim)
    assert jnp.allclose(out, ref, atol=1e-6), "mismatch vs reference gather"

    print("KERNEL_OK")
</pallas_src>

<mosaic_0001>
module attributes {stable_mosaic.version = 11 : i64} {
  func.func @_gather_kernel(%arg0: i32, %arg1: memref<16xi32, #tpu.memory_space<smem>>, %arg2: memref<64x256xf32, #tpu.memory_space<any>>, %arg3: memref<16x256xf32, #tpu.memory_space<vmem>>, %arg4: memref<16x256xf32, #tpu.memory_space<vmem>>, %arg5: memref<8x!tpu.dma_semaphore, #tpu.memory_space<semaphore_mem>>) attributes {dimension_semantics = [#tpu.dimension_semantics<parallel>], iteration_bounds = array<i64: 1>, scalar_prefetch = 1 : i64, scratch_operands = 2 : i64, tpu.core_type = #tpu.core_type<tc>, window_params = [{}, {transform_indices = @transform_1, window_bounds = array<i64: 16, 256>}]} {
    %c16_i32 = arith.constant 16 : i32
    %0 = arith.muli %arg0, %c16_i32 : i32
    %c0_i32 = arith.constant 0 : i32
    %c8_i32 = arith.constant 8 : i32
    %1 = arith.addi %c0_i32, %c8_i32 : i32
    %c1_i32 = arith.constant 1 : i32
    scf.for %arg6 = %c0_i32 to %1 step %c1_i32  : i32 {
      %5 = arith.addi %0, %arg6 : i32
      %6 = arith.index_cast %5 : i32 to index
      %7 = memref.load %arg1[%6] : memref<16xi32, #tpu.memory_space<smem>>
      %c8_i32_8 = arith.constant 8 : i32
      %c0_i32_9 = arith.constant 0 : i32
      %8 = arith.cmpi eq, %c8_i32_8, %c0_i32_9 : i32
      %c1_i32_10 = arith.constant 1 : i32
      %9 = arith.select %8, %c1_i32_10, %c8_i32_8 : i32
      %10 = arith.remsi %arg6, %9 : i32
      %c0_i32_11 = arith.constant 0 : i32
      %11 = arith.cmpi ne, %10, %c0_i32_11 : i32
      %c0_i32_12 = arith.constant 0 : i32
      %12 = arith.cmpi slt, %10, %c0_i32_12 : i32
      %c0_i32_13 = arith.constant 0 : i32
      %13 = arith.cmpi slt, %9, %c0_i32_13 : i32
      %14 = arith.xori %12, %13 : i1
      %15 = arith.andi %14, %11 : i1
      %16 = arith.addi %10, %9 : i32
      %17 = arith.select %15, %16, %10 : i32
      %c0_i32_14 = arith.constant 0 : i32
      %18 = tpu.memref_slice %arg2[%7, %c0_i32_14] : memref<64x256xf32, #tpu.memory_space<any>> -> memref<1x256xf32, #tpu.memory_space<any>>
      %c0_i32_15 = arith.constant 0 : i32
      %19 = tpu.memref_slice %arg4[%arg6, %c0_i32_15] : memref<16x256xf32, #tpu.memory_space<vmem>> -> memref<1x256xf32, #tpu.memory_space<vmem>>
      %20 = tpu.memref_slice %arg5[%17] : memref<8x!tpu.dma_semaphore, #tpu.memory_space<semaphore_mem>> -> memref<1x!tpu.dma_semaphore, #tpu.memory_space<semaphore_mem>>
      %21 = tpu.memref_squeeze %20 : memref<1x!tpu.dma_semaphore, #tpu.memory_space<semaphore_mem>> -> memref<!tpu.dma_semaphore, #tpu.memory_space<semaphore_mem>>
      tpu.enqueue_dma source(%18 : memref<1x256xf32, #tpu.memory_space<any>>) target(%19 : memref<1x256xf32, #tpu.memory_space<vmem>>) target_semaphore(%21 : memref<!tpu.dma_semaphore, #tpu.memory_space<semaphore_mem>>)
    }
    %c8_i32_0 = arith.constant 8 : i32
    %c0_i32_1 = arith.constant 0 : i32
    %c16_i32_2 = arith.constant 16 : i32
    %2 = arith.addi %c0_i32_1, %c16_i32_2 : i32
    %c1_i32_3 = arith.constant 1 : i32
    scf.for %arg6 = %c0_i32_1 to %2 step %c1_i32_3  : i32 {
      %c8_i32_8 = arith.constant 8 : i32
      %c0_i32_9 = arith.constant 0 : i32
      %5 = arith.cmpi eq, %c8_i32_8, %c0_i32_9 : i32
      %c1_i32_10 = arith.constant 1 : i32
      %6 = arith.select %5, %c1_i32_10, %c8_i32_8 : i32
      %7 = arith.remsi %arg6, %6 : i32
      %c0_i32_11 = arith.constant 0 : i32
      %8 = arith.cmpi ne, %7, %c0_i32_11 : i32
      %c0_i32_12 = arith.constant 0 : i32
      %9 = arith.cmpi slt, %7, %c0_i32_12 : i32
      %c0_i32_13 = arith.constant 0 : i32
      %10 = arith.cmpi slt, %6, %c0_i32_13 : i32
      %11 = arith.xori %9, %10 : i1
      %12 = arith.andi %11, %8 : i1
      %13 = arith.addi %7, %6 : i32
      %14 = arith.select %12, %13, %7 : i32
      %c0_i32_14 = arith.constant 0 : i32
      %c0_i32_15 = arith.constant 0 : i32
      %15 = tpu.memref_slice %arg2[%c0_i32_14, %c0_i32_15] : memref<64x256xf32, #tpu.memory_space<any>> -> memref<1x256xf32, #tpu.memory_space<any>>
      %c0_i32_16 = arith.constant 0 : i32
      %16 = tpu.memref_slice %arg4[%arg6, %c0_i32_16] : memref<16x256xf32, #tpu.memory_space<vmem>> -> memref<1x256xf32, #tpu.memory_space<vmem>>
      %17 = tpu.memref_slice %arg5[%14] : memref<8x!tpu.dma_semaphore, #tpu.memory_space<semaphore_mem>> -> memref<1x!tpu.dma_semaphore, #tpu.memory_space<semaphore_mem>>
      %18 = tpu.memref_squeeze %17 : memref<1x!tpu.dma_semaphore, #tpu.memory_space<semaphore_mem>> -> memref<!tpu.dma_semaphore, #tpu.memory_space<semaphore_mem>>
      tpu.wait_dma2 semaphore(%18 : memref<!tpu.dma_semaphore, #tpu.memory_space<semaphore_mem>>) src(%15 : memref<1x256xf32, #tpu.memory_space<any>>) dst(%16 : memref<1x256xf32, #tpu.memory_space<vmem>>)
      %c8_i32_17 = arith.constant 8 : i32
      %19 = arith.addi %arg6, %c8_i32_17 : i32
      %c16_i32_18 = arith.constant 16 : i32
      %20 = arith.cmpi slt, %19, %c16_i32_18 : i32
      %21 = arith.extui %20 : i1 to i32
      %c0_i32_19 = arith.constant 0 : i32
      %22 = arith.cmpi ne, %21, %c0_i32_19 : i32
      scf.if %22 {
        %c8_i32_20 = arith.constant 8 : i32
        %23 = arith.addi %arg6, %c8_i32_20 : i32
        %24 = arith.addi %0, %23 : i32
        %25 = arith.index_cast %24 : i32 to index
        %26 = memref.load %arg1[%25] : memref<16xi32, #tpu.memory_space<smem>>
        %c8_i32_21 = arith.constant 8 : i32
        %c0_i32_22 = arith.constant 0 : i32
        %27 = arith.cmpi eq, %c8_i32_21, %c0_i32_22 : i32
        %c1_i32_23 = arith.constant 1 : i32
        %28 = arith.select %27, %c1_i32_23, %c8_i32_21 : i32
        %29 = arith.remsi %23, %28 : i32
        %c0_i32_24 = arith.constant 0 : i32
        %30 = arith.cmpi ne, %29, %c0_i32_24 : i32
        %c0_i32_25 = arith.constant 0 : i32
        %31 = arith.cmpi slt, %29, %c0_i32_25 : i32
        %c0_i32_26 = arith.constant 0 : i32
        %32 = arith.cmpi slt, %28, %c0_i32_26 : i32
        %33 = arith.xori %31, %32 : i1
        %34 = arith.andi %33, %30 : i1
        %35 = arith.addi %29, %28 : i32
        %36 = arith.select %34, %35, %29 : i32
        %c0_i32_27 = arith.constant 0 : i32
        %37 = tpu.memref_slice %arg2[%26, %c0_i32_27] : memref<64x256xf32, #tpu.memory_space<any>> -> memref<1x256xf32, #tpu.memory_space<any>>
        %c0_i32_28 = arith.constant 0 : i32
        %38 = tpu.memref_slice %arg4[%23, %c0_i32_28] : memref<16x256xf32, #tpu.memory_space<vmem>> -> memref<1x256xf32, #tpu.memory_space<vmem>>
        %39 = tpu.memref_slice %arg5[%36] : memref<8x!tpu.dma_semaphore, #tpu.memory_space<semaphore_mem>> -> memref<1x!tpu.dma_semaphore, #tpu.memory_space<semaphore_mem>>
        %40 = tpu.memref_squeeze %39 : memref<1x!tpu.dma_semaphore, #tpu.memory_space<semaphore_mem>> -> memref<!tpu.dma_semaphore, #tpu.memory_space<semaphore_mem>>
        tpu.enqueue_dma source(%37 : memref<1x256xf32, #tpu.memory_space<any>>) target(%38 : memref<1x256xf32, #tpu.memory_space<vmem>>) target_semaphore(%40 : memref<!tpu.dma_semaphore, #tpu.memory_space<semaphore_mem>>)
      } else {
      }
    }
    %c16_i32_4 = arith.constant 16 : i32
    %c0 = arith.constant 0 : index
    %c0_5 = arith.constant 0 : index
    %3 = vector.load %arg4[%c0, %c0_5] : memref<16x256xf32, #tpu.memory_space<vmem>>, vector<16x256xf32>
    %c0_6 = arith.constant 0 : index
    %c0_7 = arith.constant 0 : index
    %4 = vector.load %arg3[%c0_6, %c0_7] : memref<16x256xf32, #tpu.memory_space<vmem>>, vector<16x256xf32>
    tpu.vector_store %arg3[%c0_6, %c0_7], %3 {strides = array<i32>} : memref<16x256xf32, #tpu.memory_space<vmem>>, vector<16x256xf32>,
    return
  }
  func.func @transform_1(%arg0: i32, %arg1: memref<16xi32, #tpu.memory_space<smem>>) -> (i32, i32) {
    %c0_i32 = arith.constant 0 : i32
    %c0_i32_0 = arith.constant 0 : i32
    return %arg0, %c0_i32 : i32, i32
  }
}

</mosaic_0001>

<bundles_post_ra>
// kernel: tpu_custom_call.1
= control target key start
LH: loop header
LB: loop body
LE: loop exit
PB: predicated region body
PF: predicated region fallthrough
CT: control target
= control target key end

     0   :  { %s530_s0 = inlined_call_operand.hbm [shape: s32[16], index: 0, kind: input, shape index: {}]   ;;  %s531_s1 = inlined_call_operand.hbm [shape: f32[64,256], index: 1, kind: input, shape index: {}]   ;;  %s532_s2 = inlined_call_operand.hbm [shape: f32[16,256], index: 2, kind: output, shape index: {}]  }
   0x1   :  { %s267_s11 = scalar_lea.hbm %s530_s0, 16 }
   0x2   :  { %p268_p0 = scmp.ne.s32.totalorder %s530_s0, %s267_s11  ;;  %p271_p1 = scmp.lt.u32.totalorder %s267_s11, %s530_s0 }
   0x4   :  { %p273_p2 = pnand %p271_p1, %p268_p0 }
   0x6   :  { %276 = shalt.err (!%p273_p2)  }
   0x7   :  { %s373_s16 = smov [#allocation5]  }
   0x8   :  { %8 = dma.hbm_to_smem %s530_s0, 16, %s373_s16, [#allocation4] }
   0x9   :  { %359 = dma.done.wait [#allocation4], 16 }
   0xa   :  { %360 = vsyncadd [#allocation4], 4294967280 }
   0xb   :  { %10 = sfence }
   0xc   :  { %11 = vsyncpa [#allocation7], 0  ;;  %s409_s19 = smov 0  }
   0xd LB: > { %s20_s20 = sld [smem:[#allocation5 + %s367_s19]]  ;;  %p21_p3 = scmp.lt.s32.totalorder %s367_s19, 0  ;;  %s367_s19 = sphi %s409_s19, %s18_s19  }
   0xe   : > { %s22_s0 = ssub.s32 0, %s367_s19  ;;  %s39_s21 = sshrl.u32 %s367_s19, 3 }
   0xf   : > { %s214_s22 = smin.u32 %s367_s19, %s22_s0  ;;  %s40_s23 = sand.u32 7, %s367_s19  }
  0x10   : > { %s24_s24 = sand.u32 7, %s214_s22   ;;  %s219_s25 = sshll.u32 %s39_s21, 4 }
  0x11   : > { %s25_s26 = ssub.s32 0, %s24_s24  ;;  %s42_s27 = sadd.s32 %s219_s25, %s40_s23 }
  0x12   : > { %s534_s26 = smov (!%p21_p3, %s25_s26), %s24_s24  ;;  %s43_s5 = scalar_lea.vmem [#allocation2], %s42_s27 }
  0x13   : > { %s33_s28 = sshrl.u32 %s20_s20, 3  ;;  %s34_s29 = sand.u32 7, %s20_s20  }
  0x14   : > { %p216_p4 = scmp.lt.s32.totalorder %s534_s26, 0  ;;  %s31_s30 = sadd.s32 8, %s534_s26 }
  0x15   : > { %s217_s3 = sshll.u32 %s33_s28, 4  ;;  %s46_s6 = sshll.u32 %s43_s5, 4  ;;  %s427_s6 = int_to_ptr.vmem [resolvable:$true] %s46_s6 }
  0x16   : > { %s536_s30 = smov (!%p216_p4, %s31_s30), %s534_s26  ;;  %s36_s4 = sadd.s32 %s217_s3, %s34_s29 }
  0x17   : > { %s218_s7 = sshll.u32 %s36_s4, 4  ;;  %s44_s11 = scalar_lea.sflag [#allocation3], %s536_s30 }
  0x18   : > { %s425_s10 = scalar_lea.hbm %s531_s1, %s218_s7  ;;  %s279_s15 = scalar_lea.hbm %s531_s1, 2048 }
  0x19   : > { %s277_s12 = scalar_lea.hbm %s425_s10, 32  ;;  %p280_p6 = scmp.lt.u32.totalorder %s425_s10, %s531_s1 }
  0x1a   : > { %p278_p5 = scmp.ne.s32.totalorder %s425_s10, %s277_s12  ;;  %p281_p7 = scmp.lt.u32.totalorder %s279_s15, %s277_s12 }
  0x1b   : > { %p283_p9 = scmp.lt.u32.totalorder %s277_s12, %s425_s10 }
  0x1c   : > { %p282_p8 = por %p281_p7, %p280_p6 }
  0x1e   : > { %p284_p10 = por %p283_p9, %p282_p8 }
  0x20   : > { %p285_p11 = pnand %p284_p10, %p278_p5 }
  0x22   : > { %288 = shalt.err (!%p285_p11)  }
  0x23   : > { %s289_s0 = scalar_lea.vmem %s427_s6, 32  ;;  %s374_s21 = smov [#allocation2]  }
  0x24   : > { %p290_p12 = scmp.ne.s32.totalorder %s427_s6, %s289_s0  ;;  %s291_s22 = sshll.u32 %s374_s21, 4  ;;  %s446_s22 = int_to_ptr.vmem [resolvable:$false] %s291_s22 }
  0x25   : > { %s293_s23 = scalar_lea.vmem %s446_s22, 512  ;;  %p294_p13 = scmp.lt.s32.totalorder %s427_s6, %s446_s22 }
  0x26   : > { %p295_p0 = scmp.lt.s32.totalorder %s293_s23, %s289_s0 }
  0x28   : > { %p296_p1 = por %p295_p0, %p294_p13 }
  0x2a   : > { %p297_p2 = pnand %p296_p1, %p290_p12 }
  0x2c   : > { %300 = shalt.err (!%p297_p2)  }
  0x2d   : > { %s375_s24 = smov 128   ;;  %s376_s25 = smov 1  }
  0x2e   : > { %49 = dma.hbm_to_vmem [thread:$0]  %s425_s10, 32, %s427_s6, %s44_s11, %s375_s24, %s375_s24, %s376_s25 }
  0x2f   : > { %s18_s19 = sadd.s32 1, %s367_s19  }
  0x30   : > { %p15_p3 = scmp.ge.s32.totalorder %s18_s19, 8  }
  0x31   :  { %s458_s26 = smov (%p15_p3), 0  }
  0x32   :  { %17 = sbr.rel (!%p15_p3) target bundleno = 13 (0xd), region = 52 }
  0x39 LB: > { %p56_p4 = scmp.lt.s32.totalorder %s371_s26, 0  ;;  %s57_s27 = ssub.s32 0, %s371_s26  ;;  %s371_s26 = sphi %s458_s26, %s55_s26  }
  0x3a   : > { %s220_s28 = smin.u32 %s371_s26, %s57_s27 }
  0x3b   : > { %s59_s29 = sand.u32 7, %s220_s28  }
  0x3c   : > { %s60_s30 = ssub.s32 0, %s59_s29 }
  0x3d   : > { %s538_s30 = smov (!%p56_p4, %s60_s30), %s59_s29 }
  0x3e   : > { %p222_p5 = scmp.lt.s32.totalorder %s538_s30, 0  ;;  %s66_s3 = sadd.s32 8, %s538_s30 }
  0x40   : > { %s540_s3 = smov (!%p222_p5, %s66_s3), %s538_s30 }
  0x41   : > { %s68_s19 = scalar_lea.sflag [#allocation3], %s540_s3 }
  0x42   : > { %361 = dma.done.wait %s68_s19, 32 }
  0x43   : > { %362 = vsyncadd %s68_s19, 4294967264  ;;  %s467_s4 = sadd.s32 8, %s371_s26 }
  0x44   : > { %p242_p6 = scmp.lt.s32.totalorder %s467_s4, 16  ;;  %p79_p7 = scmp.lt.s32.totalorder %s467_s4, 0 }
  0x45   : > { %s80_s5 = ssub.s32 0, %s467_s4  ;;  %s97_s9 = sshrl.u32 %s467_s4, 3 }
  0x46   : > { %s239_s6 = scalar_select %p242_p6, [#allocation5], [#allocation10] }
  0x47   : > { %s240_s7 = scalar_select %p242_p6, %s467_s4, 0 }
  0x48   : > { %s224_s8 = smin.u32 %s80_s5, %s467_s4  ;;  %s98_s13 = sand.u32 7, %s467_s4  }
  0x49   : > { %s78_s10 = sld [smem:[%s239_s6 + %s240_s7]]  ;;  %s82_s11 = sand.u32 7, %s224_s8  }
  0x4a   : > { %s83_s12 = ssub.s32 0, %s82_s11  ;;  %s229_s14 = sshll.u32 %s97_s9, 4 }
  0x4b   : > { %s542_s12 = smov (!%p79_p7, %s83_s12), %s82_s11  ;;  %s100_s17 = sadd.s32 %s229_s14, %s98_s13 }
  0x4c   : > { %p226_p8 = scmp.lt.s32.totalorder %s542_s12, 0  ;;  %s89_s16 = sadd.s32 8, %s542_s12 }
  0x4d   : > { %s101_s24 = scalar_lea.vmem [#allocation2], %s100_s17 }
  0x4e   : > { %s104_s25 = sshll.u32 %s101_s24, 4  ;;  %s544_s16 = smov (!%p226_p8, %s89_s16), %s542_s12  ;;  %s485_s25 = int_to_ptr.vmem [resolvable:$true] %s104_s25 }
  0x4f   : > { %s91_s18 = sshrl.u32 %s78_s10, 3  ;;  %s92_s20 = sand.u32 7, %s78_s10  }
  0x50   : > { %s227_s0 = sshll.u32 %s91_s18, 4  ;;  %s102_s3 = scalar_lea.sflag [#allocation3], %s544_s16 }
  0x51   : > { %s94_s21 = sadd.s32 %s227_s0, %s92_s20 }
  0x52   : > { %s228_s27 = sshll.u32 %s94_s21, 4 }
  0x53   : > { %s483_s30 = scalar_lea.hbm %s531_s1, %s228_s27 }
  0x54   : > { %s301_s19 = scalar_lea.hbm %s483_s30, 32  ;;  %p306_p12 = scmp.lt.u32.totalorder %s483_s30, %s531_s1 }
  0x55   : > { %p302_p9 = scmp.ne.s32.totalorder %s483_s30, %s301_s19  ;;  %p307_p13 = scmp.lt.u32.totalorder %s279_s15, %s301_s19 }
  0x56   : > { %p309_p1 = scmp.lt.u32.totalorder %s301_s19, %s483_s30 }
  0x57   : > { %p303_p10 = pnand %p302_p9, %p242_p6  ;;  %p308_p0 = por %p307_p13, %p306_p12 }
  0x59   : > { %p304_p11 = pneg %p303_p10  ;;  %p310_p2 = por %p309_p1, %p308_p0 }
  0x5b   : > { %p311_p3 = pnand %p310_p2, %p304_p11 }
  0x5d   : > { %314 = shalt.err (!%p311_p3)  }
  0x5e   : > { %s315_s9 = scalar_lea.vmem %s485_s25, 32  ;;  %p322_p8 = scmp.lt.s32.totalorder %s485_s25, %s446_s22 }
  0x5f   : > { %p316_p4 = scmp.ne.s32.totalorder %s485_s25, %s315_s9  ;;  %p323_p9 = scmp.lt.s32.totalorder %s293_s23, %s315_s9 }
  0x61   : > { %p317_p5 = pnand %p316_p4, %p242_p6  ;;  %p324_p10 = por %p323_p9, %p322_p8 }
  0x63   : > { %p318_p7 = pneg %p317_p5 }
  0x65   : > { %p325_p12 = pnand %p324_p10, %p318_p7 }
  0x67   : > { %328 = shalt.err (!%p325_p12)  }
  0x68   : > { %s377_s10 = smov 128   ;;  %s378_s11 = smov 1  }
  0x69   : > { %241 = dma.hbm_to_vmem [thread:$0]  (%p242_p6), %s483_s30, 32, %s485_s25, %s102_s3, %s377_s10, %s377_s10, %s378_s11 }
  0x6a   : > { %s55_s26 = sadd.s32 1, %s371_s26  }
  0x6b   : > { %p52_p11 = scmp.ge.s32.totalorder %s55_s26, 16  }
  0x6c   :  { %v108_v0 = vld [vmem:[#allocation2] sm:$0xff] (%p52_p11)  ;;  %v109_v1 = vld [vmem:[#allocation2 + $0x8] sm:$0xff] (%p52_p11)  ;;  %v110_v2 = vld [vmem:[#allocation2 + $0x10] sm:$0xff] (%p52_p11)  ;;  %s379_s12 = smov (%p52_p11), [#allocation6]  }
  0x6d   :  { %54 = sbr.rel (!%p52_p11) target bundleno = 57 (0x39), region = 63  ;;  %112 = vst [vmem:[#allocation6] sm:$0xff] (%p52_p11), %v108_v0  ;;  %113 = vst [vmem:[#allocation6 + $0x8] sm:$0xff] (%p52_p11), %v109_v1  ;;  %v111_v3 = vld [vmem:[#allocation2 + $0x18] sm:$0xff] (%p52_p11)  ;;  %s121_s13 = sshll.u32 (%p52_p11), %s379_s12, 4  ;;  %s122_s13 = int_to_ptr.vmem [resolvable:$true] %s121_s13 }
  0x6e   :  { %114 = vst [vmem:[#allocation6 + $0x10] sm:$0xff] (%p52_p11), %v110_v2  ;;  %115 = vst [vmem:[#allocation6 + $0x18] sm:$0xff] (%p52_p11), %v111_v3  ;;  %s329_s14 = scalar_lea.vmem (%p52_p11), %s122_s13, 512  ;;  %p334_p6 = scmp.lt.s32.totalorder (%p52_p11), %s122_s13, %s122_s13 }
  0x6f   :  { %p330_p13 = scmp.ne.s32.totalorder (%p52_p11), %s122_s13, %s329_s14  ;;  %p335_p0 = scmp.lt.s32.totalorder (%p52_p11), %s329_s14, %s329_s14 }
  0x71   :  { %p336_p1 = por (%p52_p11), %p335_p0, %p334_p6 }
  0x73   :  { %p337_p2 = pnand (%p52_p11), %p336_p1, %p330_p13 }
  0x75   :  { %340 = shalt.err (!%p337_p2)
}
  0x76   :  { %s341_s1 = scalar_lea.hbm %s532_s2, 512 }
  0x77   :  { %p342_p3 = scmp.ne.s32.totalorder %s532_s2, %s341_s1  ;;  %p345_p4 = scmp.lt.u32.totalorder %s341_s1, %s532_s2 }
  0x79   :  { %p347_p5 = pnand %p345_p4, %p342_p3 }
  0x7b   :  { %350 = shalt.err (!%p347_p5)
}
  0x7c   :  { %s380_s17 = smov 256   ;;  %s381_s18 = smov 16  }
  0x7d   :  { %127 = dma.vmem_to_hbm [thread:$0]  %s122_s13, 512, %s532_s2, [#allocation7], %s380_s17, %s380_s17, %s381_s18  }
  0x7e   :  { %363 = dma.done.wait [#allocation7], 512  }
  0x7f   :  { %364 = vsyncadd [#allocation7], 4294966784 }
  0x80   :  { %131 = vsyncpa [#allocation7], 1 }
  0x81   :  { %132 = vsyncmov [#allocation3] }
  0x84   :  { %s133_s21 = vpop.sfrf %132 }
  0x85   :  { %p230_p7 = scmp.ne.s32.totalorder %s133_s21, 0 }
  0x87   :  { %137 = shalt.err (%p230_p7)  }
  0x88   :  { %139 = vsyncmov [#allocation3 + $0x1] }
  0x8b   :  { %s140_s24 = vpop.sfrf %139 }
  0x8c   :  { %p231_p8 = scmp.ne.s32.totalorder %s140_s24, 0 }
  0x8e   :  { %144 = shalt.err (%p231_p8)  }
  0x8f   :  { %146 = vsyncmov [#allocation3 + $0x2] }
  0x92   :  { %s147_s25 = vpop.sfrf %146 }
  0x93   :  { %p232_p9 = scmp.ne.s32.totalorder %s147_s25, 0 }
  0x95   :  { %151 = shalt.err (%p232_p9)  }
  0x96   :  { %153 = vsyncmov [#allocation3 + $0x3] }
  0x99   :  { %s154_s27 = vpop.sfrf %153 }
  0x9a   :  { %p233_p10 = scmp.ne.s32.totalorder %s154_s27, 0 }
  0x9c   :  { %158 = shalt.err (%p233_p10)  }
  0x9d   :  { %160 = vsyncmov [#allocation3 + $0x4] }
  0xa0   :  { %s161_s2 = vpop.sfrf %160 }
  0xa1   :  { %p234_p12 = scmp.ne.s32.totalorder %s161_s2, 0 }
  0xa3   :  { %165 = shalt.err (%p234_p12)  }
  0xa4   :  { %167 = vsyncmov [#allocation3 + $0x5] }
  0xa7   :  { %s168_s28 = vpop.sfrf %167 }
  0xa8   :  { %p235_p11 = scmp.ne.s32.totalorder %s168_s28, 0 }
  0xaa   :  { %172 = shalt.err (%p235_p11)  }
  0xab   :  { %174 = vsyncmov [#allocation3 + $0x6] }
  0xae   :  { %s175_s29 = vpop.sfrf %174 }
  0xaf   :  { %p236_p13 = scmp.ne.s32.totalorder %s175_s29, 0 }
  0xb1   :  { %179 = shalt.err (%p236_p13)  }
  0xb2   :  { %181 = vsyncmov [#allocation3 + $0x7] }
  0xb5   :  { %s182_s30 = vpop.sfrf %181 }
  0xb6   :  { %p237_p6 = scmp.ne.s32.totalorder %s182_s30, 0 }
  0xb8   :  { %186 = shalt.err (%p237_p6)  }

</bundles_post_ra>
